<compile_context>
chip_gen: v6e
topology: v6e:2x2x1
jax: 0.10.0
libtpu: 0.0.40
codegen_flags: <defaults>
</compile_context>

<pallas_src>
import functools
import math

import jax
import jax.numpy as jnp
from jax.experimental import pallas as pl
from jax.experimental.pallas import tpu as pltpu

BN_EPS = 1e-5
LANE = 128
_MIB = 1 << 20


def _round_up(n, m):
    return ((n + m - 1) // m) * m


def _vmem_budget_bytes():
    try:
        cap = pltpu.get_tpu_info().vmem_capacity_bytes
    except Exception:
        cap = 64 * _MIB            # conservative fallback (v7x per-TC VMEM)
    return int(cap * 3 // 4)       # headroom for compiler-internal scratch


_VMEM_BUDGET = _vmem_budget_bytes()


def _tile_candidates(dim):
    """Multiples of 128 that evenly divide `dim` (descending, includes dim)."""
    cands = {dim}
    t = LANE
    while t < dim:
        if dim % t == 0:
            cands.add(t)
        t += LANE
    return sorted(cands, reverse=True)


def _pick_tiles_full_batch(n, k, f, out_bytes, budget):
    """(tn, tk) for the full-batch-per-block hidden-layer kernel; prefer big tn."""
    best = None
    for tn in _tile_candidates(f):
        for tk in _tile_candidates(k):
            fp = (2 * n * tk * 2          # x tile, double-buffered bf16
                  + 2 * tk * tn * 2       # wT tile, double-buffered bf16
                  + 2 * n * tn * out_bytes  # output tile, double-buffered
                  + n * tn * 4            # f32 accumulator scratch
                  + 4 * tn * 4)           # gamma/beta
            if fp <= budget and (best is None or (tn, tk) > best):
                best = (tn, tk)
    return best


def _pick_tiles_ntiled(k, f, budget, tn_n):
    """(tn, tk) for the batch-tiled kernels; prefer big tn (fewer x re-streams)."""
    best = None
    for tn in _tile_candidates(f):
        for tk in _tile_candidates(k):
            fp = (2 * tn_n * tk * 2       # x tile, double-buffered bf16
                  + 2 * tk * tn * 2       # wT tile, double-buffered bf16
                  + 2 * tn_n * tn * 4     # f32 output tile (accumulated in place)
                  + 8 * tn * 4)           # stats / gamma / beta
            if fp <= budget and (best is None or (tn, tk) > best):
                best = (tn, tk)
    return best if best is not None else (LANE, LANE)


# ----------------------------- Pallas kernels ------------------------------

def _make_fused_mlp_kernel(num_layers):
    """Whole-MLP kernel: all layers fused, hidden activations stay in VMEM."""
    nh = num_layers - 1

    def kernel(*refs):
        x_ref = refs[0]
        w_refs = refs[1:1 + num_layers]                       # bf16 [K_pad, F_pad]
        g_refs = refs[1 + num_layers:1 + num_layers + nh]     # f32  [1, F_pad]
        b_refs = refs[1 + num_layers + nh:1 + num_layers + 2 * nh]
        o_ref = refs[-1]

        inv_n = 1.0 / x_ref.shape[0]
        h = x_ref[...]                                        # bf16
        for i in range(nh):
            y = jnp.dot(h.astype(jnp.bfloat16), w_refs[i][...],
                        preferred_element_type=jnp.float32)
            # One-pass BatchNorm1d (training mode): batch mean, biased variance.
            s = jnp.sum(y, axis=0, keepdims=True)
            ss = jnp.sum(y * y, axis=0, keepdims=True)
            mean = s * inv_n
            var = jnp.maximum(ss * inv_n - mean * mean, 0.0)
            y = (y - mean) * jax.lax.rsqrt(var + BN_EPS)
            y = y * g_refs[i][...] + b_refs[i][...]
            h = jnp.maximum(y, 0.0)
        o_ref[...] = jnp.dot(h.astype(jnp.bfloat16), w_refs[-1][...],
                             preferred_element_type=jnp.float32).astype(o_ref.dtype)

    return kernel


def _linbnrelu_fullbatch_kernel(x_ref, wT_ref, g_ref, b_ref, o_ref, acc_ref):
    """One hidden layer, full batch per block: K-accumulate, BN+ReLU epilogue.

    Blocks: x [N, TK] bf16, wT [TK, TN] bf16, g/b [1, TN] f32,
            o [N, TN] bf16, acc [N, TN] f32 (kept because output is bf16).
    """
    k = pl.program_id(1)

    @pl.when(k == 0)
    def _():
        acc_ref[...] = jnp.zeros_like(acc_ref)

    acc_ref[...] += jnp.dot(x_ref[...], wT_ref[...],
                            preferred_element_type=jnp.float32)

    @pl.when(k == pl.num_programs(1) - 1)
    def _():
        y = acc_ref[...]
        inv_n = 1.0 / y.shape[0]
        s = jnp.sum(y, axis=0, keepdims=True)
        ss = jnp.sum(y * y, axis=0, keepdims=True)
        mean = s * inv_n
        var = jnp.maximum(ss * inv_n - mean * mean, 0.0)
        yn = (y - mean) * jax.lax.rsqrt(var + BN_EPS)
        yn = yn * g_ref[...] + b_ref[...]
        o_ref[...] = jnp.maximum(yn, 0.0).astype(o_ref.dtype)


def _linear_kernel(x_ref, wT_ref, o_ref):
    """Plain matmul; accumulates directly into the VMEM-resident f32 output block
    (output block index is constant across the K axis -> no scratch needed)."""
    @pl.when(pl.program_id(2) == 0)
    def _():
        o_ref[...] = jnp.zeros_like(o_ref)

    o_ref[...] += jnp.dot(x_ref[...], wT_ref[...],
                          preferred_element_type=jnp.float32)


def _matmul_stats_kernel(x_ref, wT_ref, y_ref, sum_ref, ssq_ref):
    """Batch-tiled matmul that also accumulates exact per-feature sum / sum-sq.

    Grid (feature tiles, batch tiles, K tiles).  y block index (n, j) is constant
    across K -> accumulate directly into the f32 y output.  Stats blocks (0, j)
    stay resident across both batch and K axes.
    """
    nn = pl.program_id(1)
    kk = pl.program_id(2)

    @pl.when((nn == 0) & (kk == 0))
    def _():
        sum_ref[...] = jnp.zeros_like(sum_ref)
        ssq_ref[...] = jnp.zeros_like(ssq_ref)

    @pl.when(kk == 0)
    def _():
        y_ref[...] = jnp.zeros_like(y_ref)

    y_ref[...] += jnp.dot(x_ref[...], wT_ref[...],
                          preferred_element_type=jnp.float32)

    @pl.when(kk == pl.num_programs(2) - 1)
    def _():
        y = y_ref[...]
        sum_ref[...] += jnp.sum(y, axis=0, keepdims=True)
        ssq_ref[...] += jnp.sum(y * y, axis=0, keepdims=True)


def _bn_relu_kernel(n_real, y_ref, sum_ref, ssq_ref, g_ref, b_ref, o_ref):
    """Second pass for the batch-tiled path: BN (exact batch stats) + ReLU, with
    padded batch rows masked to zero so downstream BN statistics stay exact."""
    inv_n = 1.0 / n_real
    y = y_ref[...]
    mean = sum_ref[...] * inv_n
    var = jnp.maximum(ssq_ref[...] * inv_n - mean * mean, 0.0)
    out = (y - mean) * jax.lax.rsqrt(var + BN_EPS) * g_ref[...] + b_ref[...]
    out = jnp.maximum(out, 0.0)
    rows = (pl.program_id(1) * y.shape[0]
            + jax.lax.broadcasted_iota(jnp.int32, y.shape, 0))
    out = jnp.where(rows < n_real, out, 0.0)
    o_ref[...] = out.astype(o_ref.dtype)


def _linear_bias_kernel(x_ref, wT_ref, b_ref, o_ref):
    y = jnp.dot(x_ref[...], wT_ref[...], preferred_element_type=jnp.float32)
    o_ref[...] = (y + b_ref[...]).astype(o_ref.dtype)


# ------------------------------ host wrappers -------------------------------

def mlp_fused(x, params, num_layers):
    """Single grid-less pallas_call for the whole MLP (tiny shapes only)."""
    n = x.shape[0]
    out_pad = params["wT"][-1].shape[1]
    inputs = [x] + list(params["wT"]) + list(params["gamma"]) + list(params["beta"])
    return pl.pallas_call(
        _make_fused_mlp_kernel(num_layers),
        out_shape=jax.ShapeDtypeStruct((n, out_pad), jnp.float32),
        compiler_params=pltpu.CompilerParams(vmem_limit_bytes=_VMEM_BUDGET),
    )(*inputs)


def linear_bn_relu_fullbatch(x, wT, gamma2d, beta2d):
    """x: [N, K_pad] bf16, wT: [K_pad, F_pad] bf16 -> [N, F_pad] bf16."""
    n, k = x.shape
    f = wT.shape[1]
    tiles = _pick_tiles_full_batch(n, k, f, out_bytes=2, budget=_VMEM_BUDGET)
    tn, tk = tiles if tiles is not None else (LANE, LANE)
    cost = pl.CostEstimate(flops=2 * n * k * f, transcendentals=f,
                           bytes_accessed=n * k * 2 + k * f * 2 + n * f * 2)
    return pl.pallas_call(
        _linbnrelu_fullbatch_kernel,
        out_shape=jax.ShapeDtypeStruct((n, f), jnp.bfloat16),
        grid_spec=pltpu.PrefetchScalarGridSpec(
            num_scalar_prefetch=0,
            grid=(f // tn, k // tk),
            in_specs=[
                pl.BlockSpec((n, tk), lambda j, kk: (0, kk)),
                pl.BlockSpec((tk, tn), lambda j, kk: (kk, j)),
                pl.BlockSpec((1, tn), lambda j, kk: (0, j)),
                pl.BlockSpec((1, tn), lambda j, kk: (0, j)),
            ],
            out_specs=pl.BlockSpec((n, tn), lambda j, kk: (0, j)),
            scratch_shapes=[pltpu.VMEM((n, tn), jnp.float32)],
        ),
        compiler_params=pltpu.CompilerParams(
            dimension_semantics=("parallel", "arbitrary"),
            vmem_limit_bytes=_VMEM_BUDGET),
        cost_estimate=cost,
    )(x, wT, gamma2d, beta2d)


def linear_bn_relu_ntiled(x, wT, gamma2d, beta2d, n_real, tn_n):
    """Batch-tiled hidden layer: exact BN via (matmul + stats) pass, then a
    lightweight normalize + ReLU pass.  x: [N_pad, K_pad] bf16 -> bf16."""
    np_, k = x.shape
    f = wT.shape[1]
    tn, tk = _pick_tiles_ntiled(k, f, _VMEM_BUDGET, tn_n)
    cost = pl.CostEstimate(flops=2 * np_ * k * f, transcendentals=f,
                           bytes_accessed=np_ * k * 2 + k * f * 2 + np_ * f * 4)
    # TODO(synk): keep the pre-BN y in f32 for numerically exact statistics;
    # it costs one extra HBM round-trip of y on this (large-batch) path only.
    y, ssum, ssq = pl.pallas_call(
        _matmul_stats_kernel,
        out_shape=(jax.ShapeDtypeStruct((np_, f), jnp.float32),
                   jax.ShapeDtypeStruct((1, f), jnp.float32),
                   jax.ShapeDtypeStruct((1, f), jnp.float32)),
        grid_spec=pltpu.PrefetchScalarGridSpec(
            num_scalar_prefetch=0,
            grid=(f // tn, np_ // tn_n, k // tk),
            in_specs=[
                pl.BlockSpec((tn_n, tk), lambda j, nn, kk: (nn, kk)),
                pl.BlockSpec((tk, tn), lambda j, nn, kk: (kk, j)),
            ],
            out_specs=[
                pl.BlockSpec((tn_n, tn), lambda j, nn, kk: (nn, j)),
                pl.BlockSpec((1, tn), lambda j, nn, kk: (0, j)),
                pl.BlockSpec((1, tn), lambda j, nn, kk: (0, j)),
            ],
        ),
        compiler_params=pltpu.CompilerParams(
            dimension_semantics=("parallel", "arbitrary", "arbitrary"),
            vmem_limit_bytes=_VMEM_BUDGET),
        cost_estimate=cost,
    )(x, wT)

    return pl.pallas_call(
        functools.partial(_bn_relu_kernel, n_real),
        out_shape=jax.ShapeDtypeStruct((np_, f), jnp.bfloat16),
        grid_spec=pltpu.PrefetchScalarGridSpec(
            num_scalar_prefetch=0,
            grid=(f // tn, np_ // tn_n),
            in_specs=[
                pl.BlockSpec((tn_n, tn), lambda j, nn: (nn, j)),
                pl.BlockSpec((1, tn), lambda j, nn: (0, j)),
                pl.BlockSpec((1, tn), lambda j, nn: (0, j)),
                pl.BlockSpec((1, tn), lambda j, nn: (0, j)),
                pl.BlockSpec((1, tn), lambda j, nn: (0, j)),
            ],
            out_specs=pl.BlockSpec((tn_n, tn), lambda j, nn: (nn, j)),
        ),
        compiler_params=pltpu.CompilerParams(
            dimension_semantics=("parallel", "parallel"),
            vmem_limit_bytes=_VMEM_BUDGET),
    )(y, ssum, ssq, gamma2d, beta2d)


def linear_tiled(x, wT, tn_n=None):
    """Final Linear: x [N, K_pad] bf16, wT [K_pad, F_pad] bf16 -> [N, F_pad] f32.
    Accumulates directly into the output block (no scratch)."""
    n, k = x.shape
    f = wT.shape[1]
    if tn_n is None or tn_n >= n:
        tn_n = n
    tn, tk = _pick_tiles_ntiled(k, f, _VMEM_BUDGET, tn_n)
    cost = pl.CostEstimate(flops=2 * n * k * f, transcendentals=0,
                           bytes_accessed=n * k * 2 + k * f * 2 + n * f * 4)
    return pl.pallas_call(
        _linear_kernel,
        out_shape=jax.ShapeDtypeStruct((n, f), jnp.float32),
        grid_spec=pltpu.PrefetchScalarGridSpec(
            num_scalar_prefetch=0,
            grid=(f // tn, n // tn_n, k // tk),
            in_specs=[
                pl.BlockSpec((tn_n, tk), lambda j, nn, kk: (nn, kk)),
                pl.BlockSpec((tk, tn), lambda j, nn, kk: (kk, j)),
            ],
            out_specs=pl.BlockSpec((tn_n, tn), lambda j, nn, kk: (nn, j)),
        ),
        compiler_params=pltpu.CompilerParams(
            dimension_semantics=("parallel", "arbitrary", "arbitrary"),
            vmem_limit_bytes=_VMEM_BUDGET),
        cost_estimate=cost,
    )(x, wT)


def linear_bias(x, wT, bias2d):
    # TODO(synk): tile this path if a 1-layer MLP is ever used at large shapes.
    n = x.shape[0]
    f = wT.shape[1]
    return pl.pallas_call(
        _linear_bias_kernel,
        out_shape=jax.ShapeDtypeStruct((n, f), jnp.float32),
        compiler_params=pltpu.CompilerParams(vmem_limit_bytes=_VMEM_BUDGET),
    )(x, wT, bias2d)


# ------------------------------- parameters ---------------------------------

def init_mlp_params(key, num_layers, input_dim, hidden_dim, output_dim):
    """Weights pre-transposed ([F_in,F_out]), lane-padded to 128, stored as bf16."""
    if num_layers < 1:
        raise ValueError("number of layers should be positive!")
    if num_layers == 1:
        dims = [input_dim, output_dim]
    else:
        dims = [input_dim] + [hidden_dim] * (num_layers - 1) + [output_dim]
    pdims = [_round_up(d, LANE) for d in dims]

    params = {"wT": [], "gamma": [], "beta": []}
    keys = jax.random.split(key, num_layers + 1)
    for i in range(num_layers):
        fan_in = dims[i]
        bound = 1.0 / math.sqrt(fan_in)
        w = jax.random.uniform(keys[i], (dims[i + 1], dims[i]),
                               jnp.float32, -bound, bound)      # PyTorch layout
        wT = jnp.zeros((pdims[i], pdims[i + 1]), jnp.float32)
        wT = wT.at[:dims[i], :dims[i + 1]].set(jnp.transpose(w))  # one-time
        params["wT"].append(wT.astype(jnp.bfloat16))
    if num_layers == 1:
        bound = 1.0 / math.sqrt(input_dim)
        b = jax.random.uniform(keys[-1], (output_dim,), jnp.float32, -bound, bound)
        params["bias"] = jnp.zeros((1, pdims[1]), jnp.float32).at[0, :output_dim].set(b)
    else:
        for i in range(num_layers - 1):
            # NOTE: beta must stay zero-padded so BN on padded feature columns is 0.
            params["gamma"].append(jnp.ones((1, pdims[i + 1]), jnp.float32))
            params["beta"].append(jnp.zeros((1, pdims[i + 1]), jnp.float32))
    return params


# -------------------------------- forward -----------------------------------

def _select_path(n, params, num_layers, budget=None):
    """VMEM-gated path selection (per-generation budget from get_tpu_info)."""
    budget = budget or _VMEM_BUDGET
    if num_layers == 1:
        return "linear"
    wT = params["wT"]
    k0 = wT[0].shape[0]
    maxf = max(w.shape[1] for w in wT)
    weight_bytes = sum(w.shape[0] * w.shape[1] * 2 for w in wT)
    fused_bytes = n * k0 * 2 + weight_bytes + 4 * n * maxf * 4
    # Grid-less fused path: tiny problems only (also avoids idling a TC on v7x).
    if fused_bytes <= min(budget // 4, 8 * _MIB):
        return "fused"
    # Full-batch-per-block tiled path: minimal (128,128) tile footprint must fit.
    tiled_min = (2 * n * 128 * 2 + 2 * 128 * 128 * 2 + 2 * n * 128 * 2
                 + n * 128 * 4 + 4 * 128 * 4)
    if tiled_min <= int(0.85 * budget):
        return "tiled"
    return "ntiled"


def mlp_forward(x, params, num_layers, output_dim, force_path=None):
    path = force_path if force_path is not None else _select_path(
        x.shape[0], params, num_layers)
    return _mlp_forward(x, params, num_layers=num_layers,
                        output_dim=output_dim, path=path)


@functools.partial(jax.jit, static_argnames=("num_layers", "output_dim", "path"))
def _mlp_forward(x, params, num_layers, output_dim, path):
    in_pad = params["wT"][0].shape[0]
    n, f_in = x.shape
    if f_in < in_pad:
        x = jnp.pad(x, ((0, 0), (0, in_pad - f_in)))
    x = x.astype(jnp.bfloat16)                     # bf16 activations everywhere

    if path == "linear":
        out = linear_bias(x, params["wT"][0], params["bias"])
    elif path == "fused":
        out = mlp_fused(x, params, num_layers)
    elif path == "tiled":
        h = x
        for i in range(num_layers - 1):
            h = linear_bn_relu_fullbatch(h, params["wT"][i],
                                         params["gamma"][i], params["beta"][i])
        out = linear_tiled(h, params["wT"][-1])
    else:  # "ntiled": batch-tiled, exact BN via stats-accumulation + normalize pass
        tn_n = min(256, _round_up(n, 8))
        np_ = _round_up(n, tn_n)
        h = jnp.pad(x, ((0, np_ - n), (0, 0))) if np_ > n else x
        for i in range(num_layers - 1):
            h = linear_bn_relu_ntiled(h, params["wT"][i],
                                      params["gamma"][i], params["beta"][i],
                                      n_real=n, tn_n=tn_n)
        out = linear_tiled(h, params["wT"][-1], tn_n=tn_n)
    return out[:n, :output_dim]


# ------------------------------ reference (JAX) ------------------------------

def mlp_reference(x, params, num_layers, output_dim):
    in_pad = params["wT"][0].shape[0]
    n, f_in = x.shape
    h = jnp.pad(x, ((0, 0), (0, in_pad - f_in))) if f_in < in_pad else x
    h = h.astype(jnp.bfloat16)
    if num_layers == 1:
        y = jnp.dot(h, params["wT"][0],
                    preferred_element_type=jnp.float32) + params["bias"]
        return y[:, :output_dim]
    for i in range(num_layers - 1):
        y = jnp.dot(h.astype(jnp.bfloat16), params["wT"][i],
                    preferred_element_type=jnp.float32)
        mean = jnp.mean(y, axis=0, keepdims=True)
        var = jnp.mean((y - mean) ** 2, axis=0, keepdims=True)
        y = (y - mean) / jnp.sqrt(var + BN_EPS)
        y = y * params["gamma"][i] + params["beta"][i]
        h = jnp.maximum(y, 0.0)
    out = jnp.dot(h.astype(jnp.bfloat16), params["wT"][-1],
                  preferred_element_type=jnp.float32)
    return out[:, :output_dim]


# ----------------------------------- main ------------------------------------

if __name__ == "__main__":
    key = jax.random.PRNGKey(0)
    kx, kp, kx2, kp2, kx3, kp1 = jax.random.split(key, 6)

    # 1) Small demo shapes; VMEM-gated selection picks the fully-fused path.
    num_layers, input_dim, hidden_dim, output_dim, batch = 3, 16, 32, 8, 8
    x = jax.random.normal(kx, (batch, input_dim), jnp.float32)
    params = init_mlp_params(kp, num_layers, input_dim, hidden_dim, output_dim)
    out = jax.block_until_ready(
        mlp_forward(x, params, num_layers=num_layers, output_dim=output_dim))
    ref = mlp_reference(x, params, num_layers, output_dim)
    assert out.shape == (batch, output_dim)
    assert bool(jnp.allclose(out, ref, atol=1e-2, rtol=1e-2)), "fused path mismatch"

    # 2) Larger feature dims, full-batch tiled path (K accumulation + BN epilogue).
    n2, in2, hid2, out2 = 64, 384, 384, 256
    x2 = jax.random.normal(kx2, (n2, in2), jnp.float32)
    params2 = init_mlp_params(kp2, 3, in2, hid2, out2)
    out_t = jax.block_until_ready(
        mlp_forward(x2, params2, num_layers=3, output_dim=out2, force_path="tiled"))
    ref_t = mlp_reference(x2, params2, 3, out2)
    assert out_t.shape == (n2, out2)
    assert bool(jnp.allclose(out_t, ref_t, atol=1e-2, rtol=1e-2)), "tiled path mismatch"

    # 3) Batch-tiled path (exact BN via stats kernel + normalize pass, padded rows).
    n3 = 500
    x3 = jax.random.normal(kx3, (n3, in2), jnp.float32)
    out_n = jax.block_until_ready(
        mlp_forward(x3, params2, num_layers=3, output_dim=out2, force_path="ntiled"))
    ref_n = mlp_reference(x3, params2, 3, out2)
    assert out_n.shape == (n3, out2)
    assert bool(jnp.allclose(out_n, ref_n, atol=1e-2, rtol=1e-2)), "ntiled path mismatch"

    # 4) num_layers == 1 path (plain Linear with bias).
    params1 = init_mlp_params(kp1, 1, input_dim, hidden_dim, output_dim)
    out1 = jax.block_until_ready(
        mlp_forward(x, params1, num_layers=1, output_dim=output_dim))
    ref1 = mlp_reference(x, params1, 1, output_dim)
    assert out1.shape == (batch, output_dim)
    assert bool(jnp.allclose(out1, ref1, atol=1e-2, rtol=1e-2)), "1-layer mismatch"

    print("KERNEL_OK")
</pallas_src>

<mosaic_0001>
module attributes {stable_mosaic.version = 11 : i64} {
  func.func @kernel(%arg0: memref<8x128xbf16, #tpu.memory_space<vmem>>, %arg1: memref<128x128xbf16, #tpu.memory_space<vmem>>, %arg2: memref<128x128xbf16, #tpu.memory_space<vmem>>, %arg3: memref<128x128xbf16, #tpu.memory_space<vmem>>, %arg4: memref<1x128xf32, #tpu.memory_space<vmem>>, %arg5: memref<1x128xf32, #tpu.memory_space<vmem>>, %arg6: memref<1x128xf32, #tpu.memory_space<vmem>>, %arg7: memref<1x128xf32, #tpu.memory_space<vmem>>, %arg8: memref<8x128xf32, #tpu.memory_space<vmem>>) attributes {dimension_semantics = [], scalar_prefetch = 0 : i64, scratch_operands = 0 : i64, tpu.core_type = #tpu.core_type<tc>} {
    %c0 = arith.constant 0 : index
    %c0_0 = arith.constant 0 : index
    %0 = vector.load %arg0[%c0, %c0_0] : memref<8x128xbf16, #tpu.memory_space<vmem>>, vector<8x128xbf16>
    %c0_1 = arith.constant 0 : index
    %c0_2 = arith.constant 0 : index
    %1 = vector.load %arg1[%c0_1, %c0_2] : memref<128x128xbf16, #tpu.memory_space<vmem>>, vector<128x128xbf16>
    %cst = arith.constant dense<0.000000e+00> : vector<8x128xf32>
    %2 = tpu.matmul %0, %1, %cst {dimension_numbers = #tpu.dot_dimension_numbers<[1], [0], [0], [1], [0, 0, 1, 1], [], []>} : vector<8x128xbf16>, vector<128x128xbf16>, vector<8x128xf32> -> vector<8x128xf32>
    %cst_3 = arith.constant dense<0.000000e+00> : vector<128xf32>
    %3 = vector.multi_reduction <add>, %2, %cst_3 [0] : vector<8x128xf32> to vector<128xf32>
    %4 = vector.shape_cast %3 : vector<128xf32> to vector<1x128xf32>
    %5 = arith.mulf %2, %2 : vector<8x128xf32>
    %cst_4 = arith.constant dense<0.000000e+00> : vector<128xf32>
    %6 = vector.multi_reduction <add>, %5, %cst_4 [0] : vector<8x128xf32> to vector<128xf32>
    %7 = vector.shape_cast %6 : vector<128xf32> to vector<1x128xf32>
    %cst_5 = arith.constant 1.250000e-01 : f32
    %8 = vector.broadcast %cst_5 : f32 to vector<1x128xf32>
    %9 = arith.mulf %4, %8 : vector<1x128xf32>
    %cst_6 = arith.constant 1.250000e-01 : f32
    %10 = vector.broadcast %cst_6 : f32 to vector<1x128xf32>
    %11 = arith.mulf %7, %10 : vector<1x128xf32>
    %12 = arith.mulf %9, %9 : vector<1x128xf32>
    %13 = arith.subf %11, %12 : vector<1x128xf32>
    %cst_7 = arith.constant 0.000000e+00 : f32
    %14 = vector.broadcast %cst_7 : f32 to vector<1x128xf32>
    %15 = arith.maximumf %13, %14 : vector<1x128xf32>
    %16 = vector.broadcast %9 : vector<1x128xf32> to vector<8x128xf32>
    %17 = arith.subf %2, %16 : vector<8x128xf32>
    %cst_8 = arith.constant 9.99999974E-6 : f32
    %18 = vector.broadcast %cst_8 : f32 to vector<1x128xf32>
    %19 = arith.addf %15, %18 : vector<1x128xf32>
    %20 = math.rsqrt %19 : vector<1x128xf32>
    %21 = vector.broadcast %20 : vector<1x128xf32> to vector<8x128xf32>
    %22 = arith.mulf %17, %21 : vector<8x128xf32>
    %c0_9 = arith.constant 0 : index
    %c0_10 = arith.constant 0 : index
    %23 = vector.load %arg4[%c0_9, %c0_10] : memref<1x128xf32, #tpu.memory_space<vmem>>, vector<1x128xf32>
    %24 = vector.broadcast %23 : vector<1x128xf32> to vector<8x128xf32>
    %25 = arith.mulf %22, %24 : vector<8x128xf32>
    %c0_11 = arith.constant 0 : index
    %c0_12 = arith.constant 0 : index
    %26 = vector.load %arg6[%c0_11, %c0_12] : memref<1x128xf32, #tpu.memory_space<vmem>>, vector<1x128xf32>
    %27 = vector.broadcast %26 : vector<1x128xf32> to vector<8x128xf32>
    %28 = arith.addf %25, %27 : vector<8x128xf32>
    %cst_13 = arith.constant 0.000000e+00 : f32
    %29 = vector.broadcast %cst_13 : f32 to vector<8x128xf32>
    %30 = arith.maximumf %28, %29 : vector<8x128xf32>
    %31 = arith.truncf %30 : vector<8x128xf32> to vector<8x128xbf16>
    %c0_14 = arith.constant 0 : index
    %c0_15 = arith.constant 0 : index
    %32 = vector.load %arg2[%c0_14, %c0_15] : memref<128x128xbf16, #tpu.memory_space<vmem>>, vector<128x128xbf16>
    %cst_16 = arith.constant dense<0.000000e+00> : vector<8x128xf32>
    %33 = tpu.matmul %31, %32, %cst_16 {dimension_numbers = #tpu.dot_dimension_numbers<[1], [0], [0], [1], [0, 0, 1, 1], [], []>} : vector<8x128xbf16>, vector<128x128xbf16>, vector<8x128xf32> -> vector<8x128xf32>
    %cst_17 = arith.constant dense<0.000000e+00> : vector<128xf32>
    %34 = vector.multi_reduction <add>, %33, %cst_17 [0] : vector<8x128xf32> to vector<128xf32>
    %35 = vector.shape_cast %34 : vector<128xf32> to vector<1x128xf32>
    %36 = arith.mulf %33, %33 : vector<8x128xf32>
    %cst_18 = arith.constant dense<0.000000e+00> : vector<128xf32>
    %37 = vector.multi_reduction <add>, %36, %cst_18 [0] : vector<8x128xf32> to vector<128xf32>
    %38 = vector.shape_cast %37 : vector<128xf32> to vector<1x128xf32>
    %cst_19 = arith.constant 1.250000e-01 : f32
    %39 = vector.broadcast %cst_19 : f32 to vector<1x128xf32>
    %40 = arith.mulf %35, %39 : vector<1x128xf32>
    %cst_20 = arith.constant 1.250000e-01 : f32
    %41 = vector.broadcast %cst_20 : f32 to vector<1x128xf32>
    %42 = arith.mulf %38, %41 : vector<1x128xf32>
    %43 = arith.mulf %40, %40 : vector<1x128xf32>
    %44 = arith.subf %42, %43 : vector<1x128xf32>
    %cst_21 = arith.constant 0.000000e+00 : f32
    %45 = vector.broadcast %cst_21 : f32 to vector<1x128xf32>
    %46 = arith.maximumf %44, %45 : vector<1x128xf32>
    %47 = vector.broadcast %40 : vector<1x128xf32> to vector<8x128xf32>
    %48 = arith.subf %33, %47 : vector<8x128xf32>
    %cst_22 = arith.constant 9.99999974E-6 : f32
    %49 = vector.broadcast %cst_22 : f32 to vector<1x128xf32>
    %50 = arith.addf %46, %49 : vector<1x128xf32>
    %51 = math.rsqrt %50 : vector<1x128xf32>
    %52 = vector.broadcast %51 : vector<1x128xf32> to vector<8x128xf32>
    %53 = arith.mulf %48, %52 : vector<8x128xf32>
    %c0_23 = arith.constant 0 : index
    %c0_24 = arith.constant 0 : index
    %54 = vector.load %arg5[%c0_23, %c0_24] : memref<1x128xf32, #tpu.memory_space<vmem>>, vector<1x128xf32>
    %55 = vector.broadcast %54 : vector<1x128xf32> to vector<8x128xf32>
    %56 = arith.mulf %53, %55 : vector<8x128xf32>
    %c0_25 = arith.constant 0 : index
    %c0_26 = arith.constant 0 : index
    %57 = vector.load %arg7[%c0_25, %c0_26] : memref<1x128xf32, #tpu.memory_space<vmem>>, vector<1x128xf32>
    %58 = vector.broadcast %57 : vector<1x128xf32> to vector<8x128xf32>
    %59 = arith.addf %56, %58 : vector<8x128xf32>
    %cst_27 = arith.constant 0.000000e+00 : f32
    %60 = vector.broadcast %cst_27 : f32 to vector<8x128xf32>
    %61 = arith.maximumf %59, %60 : vector<8x128xf32>
    %62 = arith.truncf %61 : vector<8x128xf32> to vector<8x128xbf16>
    %c0_28 = arith.constant 0 : index
    %c0_29 = arith.constant 0 : index
    %63 = vector.load %arg3[%c0_28, %c0_29] : memref<128x128xbf16, #tpu.memory_space<vmem>>, vector<128x128xbf16>
    %cst_30 = arith.constant dense<0.000000e+00> : vector<8x128xf32>
    %64 = tpu.matmul %62, %63, %cst_30 {dimension_numbers = #tpu.dot_dimension_numbers<[1], [0], [0], [1], [0, 0, 1, 1], [], []>} : vector<8x128xbf16>, vector<128x128xbf16>, vector<8x128xf32> -> vector<8x128xf32>
    %c0_31 = arith.constant 0 : index
    %c0_32 = arith.constant 0 : index
    %65 = vector.load %arg8[%c0_31, %c0_32] : memref<8x128xf32, #tpu.memory_space<vmem>>, vector<8x128xf32>
    tpu.vector_store %arg8[%c0_31, %c0_32], %64 {strides = array<i32>} : memref<8x128xf32, #tpu.memory_space<vmem>>, vector<8x128xf32>,
    return
  }
}

</mosaic_0001>

<bundles_post_ra>
// kernel: _mlp_forward.1
= control target key start
LH: loop header
LB: loop body
LE: loop exit
PB: predicated region body
PF: predicated region fallthrough
CT: control target
= control target key end

     0   :  { %13 = vsyncpa [#allocation3], 0  ;;  %s829_s0 = inlined_call_operand.vmem [shape: bf16[8,128], index: 0, kind: input, shape index: {}]   ;;  %s830_s1 = inlined_call_operand.hbm [shape: bf16[128,128], index: 1, kind: input, shape index: {}]   ;;  %s831_s2 = inlined_call_operand.hbm [shape: bf16[128,128], index: 2, kind: input, shape index: {}]   ;;  %s832_s3 = inlined_call_operand.hbm [shape: bf16[128,128], index: 3, kind: input, shape index: {}]   ;;  %s833_s4 = inlined_call_operand.vmem [shape: f32[1,128], index: 4, kind: input, shape index: {}]   ;;  %s834_s5 = inlined_call_operand.vmem [shape: f32[1,128], index: 5, kind: input, shape index: {}]   ;;  %s835_s6 = inlined_call_operand.vmem [shape: f32[1,128], index: 6, kind: input, shape index: {}]   ;;  %s836_s7 = inlined_call_operand.vmem [shape: f32[1,128], index: 7, kind: input, shape index: {}]   ;;  %s837_s8 = inlined_call_operand.hbm [shape: f32[8,128], index: 8, kind: output, shape index: {}]  }
   0x1   :  { %14 = vsyncpa [#allocation6], 0 }
   0x2   :  { %15 = vsyncpa [#allocation4], 0  ;;  %s719_s27 = smov [#allocation5]   ;;  %s720_s29 = smov [#allocation2]  }
   0x3   :  { %s35_s28 = sshll.u32 %s719_s27, 4  ;;  %s23_s30 = sshll.u32 %s720_s29, 4  ;;  %s36_s28 = int_to_ptr.vmem [resolvable:$true] %s35_s28  ;;  %s24_s30 = int_to_ptr.vmem [resolvable:$true] %s23_s30 }
   0x4   :  { %s641_s9 = scalar_lea.vmem %s36_s28, 1024  ;;  %p646_p1 = scmp.lt.s32.totalorder %s36_s28, %s36_s28 }
   0x5   :  { %p642_p0 = scmp.ne.s32.totalorder %s36_s28, %s641_s9  ;;  %p647_p2 = scmp.lt.s32.totalorder %s641_s9, %s641_s9 }
   0x7   :  { %p648_p3 = por %p647_p2, %p646_p1 }
   0x9   :  { %p649_p4 = pnand %p648_p3, %p642_p0 }
   0xb   :  { %652 = shalt.err (!%p649_p4)
}
   0xc   :  { %s721_s10 = smov 64   ;;  %s722_s11 = smov 4  }
   0xd   :  { %41 = dma.hbm_to_vmem [thread:$0]  %s831_s2, 1024, %s36_s28, [#allocation6], %s721_s10, %s721_s10, %s722_s11  }
   0xe   :  { %s661_s14 = scalar_lea.vmem %s24_s30, 1024  ;;  %p666_p6 = scmp.lt.s32.totalorder %s24_s30, %s24_s30 }
   0xf   :  { %p662_p5 = scmp.ne.s32.totalorder %s24_s30, %s661_s14  ;;  %p667_p7 = scmp.lt.s32.totalorder %s661_s14, %s661_s14 }
  0x11   :  { %p668_p8 = por %p667_p7, %p666_p6 }
  0x13   :  { %p669_p9 = pnand %p668_p8, %p662_p5 }
  0x15   :  { %672 = shalt.err (!%p669_p9)
}
  0x16   :  { %29 = dma.hbm_to_vmem [thread:$0]  %s830_s1, 1024, %s24_s30, [#allocation3], %s721_s10, %s721_s10, %s722_s11  }
  0x17   :  { %s723_s17 = smov [#allocation7]  }
  0x18   :  { %s47_s18 = sshll.u32 %s723_s17, 4  ;;  %s48_s18 = int_to_ptr.vmem [resolvable:$true] %s47_s18 }
  0x19   :  { %s681_s19 = scalar_lea.vmem %s48_s18, 1024  ;;  %p686_p11 = scmp.lt.s32.totalorder %s48_s18, %s48_s18 }
  0x1a   :  { %p682_p10 = scmp.ne.s32.totalorder %s48_s18, %s681_s19  ;;  %p687_p12 = scmp.lt.s32.totalorder %s681_s19, %s681_s19 }
  0x1c   :  { %p688_p13 = por %p687_p12, %p686_p11 }
  0x1e   :  { %p689_p0 = pnand %p688_p13, %p682_p10 }
  0x20   :  { %692 = shalt.err (!%p689_p0)
}
  0x21   :  { %53 = dma.hbm_to_vmem [thread:$0]  %s832_s3, 1024, %s48_s18, [#allocation6], %s721_s10, %s721_s10, %s722_s11  }
  0x22   :  { %713 = dma.done.wait [#allocation3], 1024  }
  0x23   :  { %714 = vsyncadd [#allocation3], 4294966272 }
  0x24   :  { %715 = dma.done.wait [#allocation6], 2048  }
  0x25   :  { %716 = vsyncadd [#allocation6], 4294965248  ;;  %v724_v0 = vmov 0.0   ;;  %vm725_vm0 = vmmov 0   ;;  %v605_v1 = vld [vmem:[#allocation2 + $0x38] sm:$0xff]   ;;  %v606_v2 = vld [vmem:[#allocation2 + $0x30] sm:$0xff]  }
  0x26   :  { %537 = vmatprep.subr.bf16.mxu0 %v724_v0  ;;  %553 = vmatprep.mubr.msk.bf16.mxu0 %vm725_vm0, %v724_v0  ;;  %v607_v3 = vld [vmem:[#allocation2 + $0x28] sm:$0xff]   ;;  %v608_v4 = vld [vmem:[#allocation2 + $0x20] sm:$0xff]   ;;  %v609_v5 = vld [vmem:[#allocation2 + $0x18] sm:$0xff]   ;;  %s726_s26 = smov [#allocation8]  }
  0x27   :  { %557 = vmatprep.subr.bf16.mxu1 %v724_v0  ;;  %573 = vmatprep.mubr.msk.bf16.mxu1 %vm725_vm0, %v724_v0  ;;  %v610_v6 = vld [vmem:[#allocation2 + $0x10] sm:$0xff]   ;;  %v611_v7 = vld [vmem:[#allocation2 + $0x8] sm:$0xff]   ;;  %v612_v8 = vld [vmem:[#allocation2] sm:$0xff]   ;;  %s472_s27 = sshll.u32 %s726_s26, 4  ;;  %s473_s27 = int_to_ptr.vmem [resolvable:$true] %s472_s27 }
  0x28   :  { %538 = vmatpush3.bf16.msra.mxu0 %v605_v1  ;;  %v72_v9 = vld [vmem:[%s829_s0] sm:$0xf]  ;;  %v613_v10 = vld [vmem:[#allocation5 + $0x38] sm:$0xff]   ;;  %v614_v11 = vld [vmem:[#allocation5 + $0x30] sm:$0xff]   ;;  %s693_s28 = scalar_lea.vmem %s473_s27, 128  ;;  %p698_p2 = scmp.lt.s32.totalorder %s473_s27, %s473_s27 }
  0x29   :  { %539 = vmatprep.subr.bf16.mxu0 %v724_v0  ;;  %558 = vmatpush3.bf16.msra.mxu1 %v613_v10  ;;  %v615_v12 = vld [vmem:[#allocation5 + $0x28] sm:$0xff]   ;;  %v616_v13 = vld [vmem:[#allocation5 + $0x20] sm:$0xff]   ;;  %v617_v14 = vld [vmem:[#allocation5 + $0x18] sm:$0xff]   ;;  %p694_p1 = scmp.ne.s32.totalorder %s473_s27, %s693_s28  ;;  %p699_p3 = scmp.lt.s32.totalorder %s693_s28, %s693_s28 }
  0x2a   :  { %559 = vmatprep.subr.bf16.mxu1 %v724_v0  ;;  %v618_v15 = vld [vmem:[#allocation5 + $0x10] sm:$0xff]   ;;  %v619_v16 = vld [vmem:[#allocation5 + $0x8] sm:$0xff]   ;;  %v620_v17 = vld [vmem:[#allocation5] sm:$0xff]  }
  0x2b   :  { %v490_v43 = vld [vmem:[%s833_s4] ss:$0 sm:$0xff]  ;;  %v621_v50 = vld [vmem:[#allocation7 + $0x38] sm:$0xff]   ;;  %v622_v51 = vld [vmem:[#allocation7 + $0x30] sm:$0xff]   ;;  %p700_p4 = por %p699_p3, %p698_p2 }
  0x2c   :  { %540 = vmatpush3.bf16.msra.mxu0 %v606_v2  ;;  %v491_v45 = vld [vmem:[%s835_s6] ss:$0 sm:$0xff]  ;;  %v623_v52 = vld [vmem:[#allocation7 + $0x28] sm:$0xff]   ;;  %v625_v54 = vld [vmem:[#allocation7 + $0x18] sm:$0xff]  }
  0x2d   :  { %541 = vmatprep.subr.bf16.mxu0 %v724_v0  ;;  %560 = vmatpush3.bf16.msra.mxu1 %v614_v11  ;;  %v624_v53 = vld [vmem:[#allocation7 + $0x20] sm:$0xff]   ;;  %v626_v55 = vld [vmem:[#allocation7 + $0x10] sm:$0xff]   ;;  %v627_v56 = vld [vmem:[#allocation7 + $0x8] sm:$0xff]   ;;  %p701_p5 = pnand %p700_p4, %p694_p1 }
  0x2e   :  { %561 = vmatprep.subr.bf16.mxu1 %v724_v0  ;;  %v628_v57 = vld [vmem:[#allocation7] sm:$0xff]  }
  0x30   :  { %542 = vmatpush3.bf16.msra.mxu0 %v607_v3 }
  0x31   :  { %543 = vmatprep.subr.bf16.mxu0 %v724_v0  ;;  %562 = vmatpush3.bf16.msra.mxu1 %v615_v12 }
  0x32   :  { %563 = vmatprep.subr.bf16.mxu1 %v724_v0 }
  0x34   :  { %544 = vmatpush3.bf16.msra.mxu0 %v608_v4 }
  0x35   :  { %545 = vmatprep.subr.bf16.mxu0 %v724_v0  ;;  %564 = vmatpush3.bf16.msra.mxu1 %v616_v13 }
  0x36   :  { %565 = vmatprep.subr.bf16.mxu1 %v724_v0 }
  0x38   :  { %546 = vmatpush3.bf16.msra.mxu0 %v609_v5 }
  0x39   :  { %547 = vmatprep.subr.bf16.mxu0 %v724_v0  ;;  %566 = vmatpush3.bf16.msra.mxu1 %v617_v14 }
  0x3a   :  { %567 = vmatprep.subr.bf16.mxu1 %v724_v0 }
  0x3c   :  { %548 = vmatpush3.bf16.msra.mxu0 %v610_v6 }
  0x3d   :  { %549 = vmatprep.subr.bf16.mxu0 %v724_v0  ;;  %568 = vmatpush3.bf16.msra.mxu1 %v618_v15 }
  0x3e   :  { %569 = vmatprep.subr.bf16.mxu1 %v724_v0 }
  0x40   :  { %550 = vmatpush3.bf16.msra.mxu0 %v611_v7 }
  0x41   :  { %551 = vmatprep.subr.bf16.mxu0 %v724_v0  ;;  %570 = vmatpush3.bf16.msra.mxu1 %v619_v16 }
  0x42   :  { %571 = vmatprep.subr.bf16.mxu1 %v724_v0 }
  0x44   :  { %552 = vmatpush3.bf16.msra.mxu0 %v612_v8 }
  0x45   :  { %577 = vmatprep.subr.bf16.mxu0 %v724_v0  ;;  %572 = vmatpush3.bf16.msra.mxu1 %v620_v17 }
  0x47   :  { %554 = vmatmul.mubr.bf16.vlgmr.msra.gmra.mxu0 %v72_v9 }
  0x48   :  { %593 = vmatprep.mubr.msk.bf16.mxu0 %vm725_vm0, %v724_v0  ;;  %578 = vmatpush3.bf16.msra.mxu0 %v621_v50 }
  0x49   :  { %579 = vmatprep.subr.bf16.mxu0 %v724_v0 }
  0x4c   :  { %580 = vmatpush3.bf16.msra.mxu0 %v622_v51 }
  0x4d   :  { %581 = vmatprep.subr.bf16.mxu0 %v724_v0 }
  0x50   :  { %582 = vmatpush3.bf16.msra.mxu0 %v623_v52 }
  0x51   :  { %583 = vmatprep.subr.bf16.mxu0 %v724_v0 }
  0x54   :  { %584 = vmatpush3.bf16.msra.mxu0 %v624_v53 }
  0x55   :  { %585 = vmatprep.subr.bf16.mxu0 %v724_v0 }
  0x58   :  { %586 = vmatpush3.bf16.msra.mxu0 %v625_v54 }
  0x59   :  { %587 = vmatprep.subr.bf16.mxu0 %v724_v0 }
  0x5c   :  { %588 = vmatpush3.bf16.msra.mxu0 %v626_v55 }
  0x5d   :  { %589 = vmatprep.subr.bf16.mxu0 %v724_v0 }
  0x60   :  { %590 = vmatpush3.bf16.msra.mxu0 %v627_v56 }
  0x61   :  { %591 = vmatprep.subr.bf16.mxu0 %v724_v0 }
  0x64   :  { %592 = vmatpush3.bf16.msra.mxu0 %v628_v57 }
 0x107   :  { %v171_v18 = vpop.f32.mrf.mxu0 }
 0x108   :  { %v177_v19 = vrot.slane %v171_v18, 4  ;;  %v183_v20 = vmul.f32 %v171_v18, %v171_v18 }
 0x109   :  { %v555_v21 = vpop.f32.mrf.mxu0 }
 0x10a   :  { %v178_v22 = vadd.f32 %v177_v19, %v171_v18  ;;  %v184_v23 = vrot.slane %v183_v20, 4  ;;  %v500_v19 = vld [vmem:[%s834_s5] ss:$0 sm:$0xff] }
 0x10b   :  { %v174_v24 = vpop.f32.mrf.mxu0  ;;  %v501_v21 = vld [vmem:[%s836_s7] ss:$0 sm:$0xff] }
 0x10c   :  { %v179_v25 = vrot.slane %v178_v22, 2  ;;  %v185_v26 = vadd.f32 %v184_v23, %v183_v20 }
 0x10d   :  { %v556_v27 = vpop.f32.mrf.mxu0 }
 0x10e   :  { %v180_v28 = vadd.f32 %v179_v25, %v178_v22  ;;  %v186_v29 = vrot.slane %v185_v26, 2 }
 0x110   :  { %v181_v30 = vrot.slane %v180_v28, 1  ;;  %v187_v31 = vadd.f32 %v186_v29, %v185_v26 }
 0x112   :  { %v182_v32 = vadd.f32 %v181_v30, %v180_v28  ;;  %v188_v33 = vrot.slane %v187_v31, 1 }
 0x114   :  { %v189_v34 = vadd.f32 %v188_v33, %v187_v31  ;;  %v190_v35 = vmul.f32 0.125, %v182_v32 }
 0x116   :  { %v191_v36 = vmul.f32 0.125, %v189_v34  ;;  %v192_v37 = vmul.f32 %v190_v35, %v190_v35  ;;  %v195_v41 = vsub.f32 %v171_v18, %v190_v35 }
 0x118   :  { %v193_v38 = vsub.f32 %v191_v36, %v192_v37 }
 0x11a   :  { %v194_v39 = vmax.f32 %v193_v38, 0.0 }
 0x11c   :  { %v196_v40 = vadd.f32 1e-05, %v194_v39 }
 0x11e   :  { %629 = vrsqrt.f32 %v196_v40 }
 0x12b   :  { %v630_v42 = vpop.eup %629 }
 0x12c   :  { %v198_v44 = vmul.f32 %v630_v42, %v195_v41 }
 0x12e   :  { %v206_v46 = vmul.f32 %v490_v43, %v198_v44 }
 0x130   :  { %v214_v47 = vadd.f32 %v491_v45, %v206_v46 }
 0x132   :  { %v215_v48 = vmax.f32 %v214_v47, 0.0 }
 0x134   :  { %v216_v49 = vpack.c.bf16 %v215_v48, %v215_v48 }
 0x136   :  { %574 = vmatmul.mubr.bf16.vlgmr.msra.gmra.mxu1 %v216_v49 }
 0x1f6   :  { %v315_v58 = vpop.f32.mrf.mxu1 }
 0x1f7   :  { %v321_v59 = vrot.slane %v315_v58, 4  ;;  %v327_v60 = vmul.f32 %v315_v58, %v315_v58 }
 0x1f8   :  { %v575_v61 = vpop.f32.mrf.mxu1 }
 0x1f9   :  { %v322_v62 = vadd.f32 %v321_v59, %v315_v58  ;;  %v328_v63 = vrot.slane %v327_v60, 4 }
 0x1fa   :  { %v318_v1 = vpop.f32.mrf.mxu1 }
 0x1fb   :  { %v323_v2 = vrot.slane %v322_v62, 2  ;;  %v329_v3 = vadd.f32 %v328_v63, %v327_v60 }
 0x1fc   :  { %v576_v4 = vpop.f32.mrf.mxu1 }
 0x1fd   :  { %v324_v5 = vadd.f32 %v323_v2, %v322_v62  ;;  %v330_v6 = vrot.slane %v329_v3, 2 }
 0x1ff   :  { %v325_v7 = vrot.slane %v324_v5, 1  ;;  %v331_v8 = vadd.f32 %v330_v6, %v329_v3 }
 0x201   :  { %v326_v9 = vadd.f32 %v325_v7, %v324_v5  ;;  %v332_v10 = vrot.slane %v331_v8, 1 }
 0x203   :  { %v333_v11 = vadd.f32 %v332_v10, %v331_v8  ;;  %v334_v12 = vmul.f32 0.125, %v326_v9 }
 0x205   :  { %v335_v0 = vmul.f32 0.125, %v333_v11  ;;  %v336_v13 = vmul.f32 %v334_v12, %v334_v12  ;;  %v339_v17 = vsub.f32 %v315_v58, %v334_v12 }
 0x207   :  { %v337_v14 = vsub.f32 %v335_v0, %v336_v13 }
 0x209   :  { %v338_v15 = vmax.f32 %v337_v14, 0.0 }
 0x20b   :  { %v340_v16 = vadd.f32 1e-05, %v338_v15 }
 0x20d   :  { %631 = vrsqrt.f32 %v340_v16 }
 0x21a   :  { %v632_v18 = vpop.eup %631 }
 0x21b   :  { %v342_v20 = vmul.f32 %v632_v18, %v339_v17 }
 0x21d   :  { %v350_v22 = vmul.f32 %v500_v19, %v342_v20 }
 0x21f   :  { %v358_v23 = vadd.f32 %v501_v21, %v350_v22 }
 0x221   :  { %v359_v24 = vmax.f32 %v358_v23, 0.0 }
 0x223   :  { %v360_v25 = vpack.c.bf16 %v359_v24, %v359_v24 }
 0x225   :  { %594 = vmatmul.mubr.bf16.vlgmr.msra.gmra.mxu0 %v360_v25 }
 0x2e5   :  { %v459_v26 = vpop.f32.mrf.mxu0 }
 0x2e6   :  { %465 = vst [vmem:[#allocation8] sm:$0xff] %v459_v26 }
 0x2e7   :  { %v595_v27 = vpop.f32.mrf.mxu0 }
 0x2e8   :  { %704 = shalt.err (!%p701_p5)
}
 0x2e9   :  { %475 = dma.vmem_to_hbm [thread:$0]  %s473_s27, 128, %s837_s8, [#allocation4]   ;;  %v462_v28 = vpop.f32.mrf.mxu0 }
 0x2eb   :  { %v596_v29 = vpop.f32.mrf.mxu0 }
 0x2ec   :  { %717 = dma.done.wait [#allocation4], 128  }
 0x2ed   :  { %718 = vsyncadd [#allocation4], 4294967168 }
 0x2ee   :  { %479 = vsyncpa [#allocation3], 1 }
 0x2ef   :  { %480 = vsyncpa [#allocation6], 1 }
 0x2f0   :  { %481 = vsyncpa [#allocation4], 1 }

</bundles_post_ra>
